<compile_context>
chip_gen: v5e
topology: v5e:2x2
jax: 0.10.0
libtpu: 0.0.40
codegen_flags: <defaults>
</compile_context>

<pallas_src>
import jax
import jax.numpy as jnp
from jax.experimental import pallas as pl
from jax.experimental.pallas import tpu as pltpu

INPUT_SIZE = 32           # logical hidden / input width of the PyTorch model
NUM_ACTIONS = 4           # len(Action)
D_PAD = 128               # lane-padded hidden width
OUT_PAD = 128             # lane-padded output width
BATCH = 200               # example batch (non-multiple of tile to exercise padding)
TM = 128                  # batch tile (rows per grid step)


def mlp_kernel(x_ref, w1_ref, b1_ref, w2_ref, b2_ref,
               w3_ref, b3_ref, w4_ref, b4_ref, o_ref):
    """Entire MLP forward fused: 3x (Linear+ReLU) + Linear, one batch tile."""
    h = jnp.dot(x_ref[...], w1_ref[...], preferred_element_type=jnp.float32) + b1_ref[...]
    h = jnp.maximum(h, 0.0)

    h = jnp.dot(h, w2_ref[...], preferred_element_type=jnp.float32) + b2_ref[...]
    h = jnp.maximum(h, 0.0)

    h = jnp.dot(h, w3_ref[...], preferred_element_type=jnp.float32) + b3_ref[...]
    h = jnp.maximum(h, 0.0)

    o_ref[...] = (jnp.dot(h, w4_ref[...], preferred_element_type=jnp.float32)
                  + b4_ref[...])


def _pad_params(params):
    """Zero-pad logical (in,out) weights / (1,out) biases to lane-dense shapes."""
    (w1, b1, w2, b2, w3, b3, w4, b4) = params

    def pad_w(w, rows, cols):
        out = jnp.zeros((rows, cols), jnp.float32)
        return out.at[:w.shape[0], :w.shape[1]].set(w)

    def pad_b(b, cols):
        out = jnp.zeros((1, cols), jnp.float32)
        return out.at[:, :b.shape[1]].set(b)

    return (pad_w(w1, D_PAD, D_PAD), pad_b(b1, D_PAD),
            pad_w(w2, D_PAD, D_PAD), pad_b(b2, D_PAD),
            pad_w(w3, D_PAD, D_PAD), pad_b(b3, D_PAD),
            pad_w(w4, D_PAD, OUT_PAD), pad_b(b4, OUT_PAD))


def neural_network_forward(x, params, *, tm=TM):
    """x: (B, INPUT_SIZE) f32 -> logits (B, NUM_ACTIONS) f32."""
    padded = _pad_params(params)
    (w1, b1, w2, b2, w3, b3, w4, b4) = padded

    B = x.shape[0]
    n_tiles = pl.cdiv(B, tm)
    b_pad = n_tiles * tm

    # Zero-pad batch rows (extra rows are dead work, sliced off below) and
    # feature columns (exact: padded weight rows are zero).
    x_p = jnp.zeros((b_pad, D_PAD), jnp.float32).at[:B, :INPUT_SIZE].set(x)

    # Weights/biases: full-array blocks whose index_map ignores the batch grid
    # index -> DMA'd once, VMEM-resident across all batch tiles.
    w_spec = pl.BlockSpec((D_PAD, D_PAD), lambda i: (0, 0))
    b_spec = pl.BlockSpec((1, D_PAD), lambda i: (0, 0))
    w4_spec = pl.BlockSpec((D_PAD, OUT_PAD), lambda i: (0, 0))
    b4_spec = pl.BlockSpec((1, OUT_PAD), lambda i: (0, 0))

    out = pl.pallas_call(
        mlp_kernel,
        out_shape=jax.ShapeDtypeStruct((b_pad, OUT_PAD), jnp.float32),
        grid=(n_tiles,),
        in_specs=[
            pl.BlockSpec((tm, D_PAD), lambda i: (i, 0)),   # x tile
            w_spec, b_spec,                                # layer 1
            w_spec, b_spec,                                # layer 2
            w_spec, b_spec,                                # layer 3
            w4_spec, b4_spec,                              # layer 4
        ],
        out_specs=pl.BlockSpec((tm, OUT_PAD), lambda i: (i, 0)),
        compiler_params=pltpu.CompilerParams(
            dimension_semantics=("parallel",),             # v7x: 2 TCs split batch
        ),
    )(x_p, w1, b1, w2, b2, w3, b3, w4, b4)

    return out[:B, :NUM_ACTIONS]


def init_params(key):
    """Deterministic init mimicking nn.Linear's U(-1/sqrt(fan_in), 1/sqrt(fan_in)).

    Weights stored as (in_features, out_features) so the kernel does x @ W + b.
    """
    def linear(key, fan_in, fan_out):
        kw, kb = jax.random.split(key)
        bound = 1.0 / jnp.sqrt(fan_in)
        w = jax.random.uniform(kw, (fan_in, fan_out), jnp.float32, -bound, bound)
        b = jax.random.uniform(kb, (1, fan_out), jnp.float32, -bound, bound)
        return w, b

    k1, k2, k3, k4 = jax.random.split(key, 4)
    w1, b1 = linear(k1, INPUT_SIZE, INPUT_SIZE)
    w2, b2 = linear(k2, INPUT_SIZE, INPUT_SIZE)
    w3, b3 = linear(k3, INPUT_SIZE, INPUT_SIZE)
    w4, b4 = linear(k4, INPUT_SIZE, NUM_ACTIONS)
    return (w1, b1, w2, b2, w3, b3, w4, b4)


if __name__ == "__main__":
    key = jax.random.PRNGKey(0)
    k_params, k_x = jax.random.split(key)

    params = init_params(k_params)
    x = jax.random.normal(k_x, (BATCH, INPUT_SIZE), jnp.float32)

    logits = neural_network_forward(x, params)
    jax.block_until_ready(logits)

    # Sanity check vs. plain-JAX reference (unpadded math).
    (w1, b1, w2, b2, w3, b3, w4, b4) = params
    h = jnp.maximum(x @ w1 + b1, 0.0)
    h = jnp.maximum(h @ w2 + b2, 0.0)
    h = jnp.maximum(h @ w3 + b3, 0.0)
    ref = h @ w4 + b4

    assert logits.shape == (BATCH, NUM_ACTIONS)
    assert jnp.allclose(logits, ref, atol=1e-5, rtol=1e-5)

    print("KERNEL_OK")
</pallas_src>

<mosaic_0001>
module attributes {stable_mosaic.version = 11 : i64} {
  func.func @mlp_kernel(%arg0: i32, %arg1: memref<128x128xf32, #tpu.memory_space<vmem>>, %arg2: memref<128x128xf32, #tpu.memory_space<vmem>>, %arg3: memref<1x128xf32, #tpu.memory_space<vmem>>, %arg4: memref<128x128xf32, #tpu.memory_space<vmem>>, %arg5: memref<1x128xf32, #tpu.memory_space<vmem>>, %arg6: memref<128x128xf32, #tpu.memory_space<vmem>>, %arg7: memref<1x128xf32, #tpu.memory_space<vmem>>, %arg8: memref<128x128xf32, #tpu.memory_space<vmem>>, %arg9: memref<1x128xf32, #tpu.memory_space<vmem>>, %arg10: memref<128x128xf32, #tpu.memory_space<vmem>>) attributes {dimension_semantics = [#tpu.dimension_semantics<parallel>], iteration_bounds = array<i64: 2>, scalar_prefetch = 0 : i64, scratch_operands = 0 : i64, tpu.core_type = #tpu.core_type<tc>, window_params = [{transform_indices = @transform_0, window_bounds = array<i64: 128, 128>}, {pipeline_mode = #tpu.pipeline_mode<synchronous>, transform_indices = @transform_1, window_bounds = array<i64: 128, 128>}, {pipeline_mode = #tpu.pipeline_mode<synchronous>, transform_indices = @transform_2, window_bounds = array<i64: 1, 128>}, {pipeline_mode = #tpu.pipeline_mode<synchronous>, transform_indices = @transform_3, window_bounds = array<i64: 128, 128>}, {pipeline_mode = #tpu.pipeline_mode<synchronous>, transform_indices = @transform_4, window_bounds = array<i64: 1, 128>}, {pipeline_mode = #tpu.pipeline_mode<synchronous>, transform_indices = @transform_5, window_bounds = array<i64: 128, 128>}, {pipeline_mode = #tpu.pipeline_mode<synchronous>, transform_indices = @transform_6, window_bounds = array<i64: 1, 128>}, {pipeline_mode = #tpu.pipeline_mode<synchronous>, transform_indices = @transform_7, window_bounds = array<i64: 128, 128>}, {pipeline_mode = #tpu.pipeline_mode<synchronous>, transform_indices = @transform_8, window_bounds = array<i64: 1, 128>}, {transform_indices = @transform_9, window_bounds = array<i64: 128, 128>}]} {
    %c0 = arith.constant 0 : index
    %c0_0 = arith.constant 0 : index
    %0 = vector.load %arg1[%c0, %c0_0] : memref<128x128xf32, #tpu.memory_space<vmem>>, vector<128x128xf32>
    %c0_1 = arith.constant 0 : index
    %c0_2 = arith.constant 0 : index
    %1 = vector.load %arg2[%c0_1, %c0_2] : memref<128x128xf32, #tpu.memory_space<vmem>>, vector<128x128xf32>
    %cst = arith.constant dense<0.000000e+00> : vector<128x128xf32>
    %2 = tpu.matmul %0, %1, %cst {dimension_numbers = #tpu.dot_dimension_numbers<[1], [0], [0], [1], [0, 0, 1, 1], [], []>} : vector<128x128xf32>, vector<128x128xf32>, vector<128x128xf32> -> vector<128x128xf32>
    %c0_3 = arith.constant 0 : index
    %c0_4 = arith.constant 0 : index
    %3 = vector.load %arg3[%c0_3, %c0_4] : memref<1x128xf32, #tpu.memory_space<vmem>>, vector<1x128xf32>
    %4 = vector.broadcast %3 : vector<1x128xf32> to vector<128x128xf32>
    %5 = arith.addf %2, %4 : vector<128x128xf32>
    %cst_5 = arith.constant 0.000000e+00 : f32
    %6 = vector.broadcast %cst_5 : f32 to vector<128x128xf32>
    %7 = arith.maximumf %5, %6 : vector<128x128xf32>
    %c0_6 = arith.constant 0 : index
    %c0_7 = arith.constant 0 : index
    %8 = vector.load %arg4[%c0_6, %c0_7] : memref<128x128xf32, #tpu.memory_space<vmem>>, vector<128x128xf32>
    %cst_8 = arith.constant dense<0.000000e+00> : vector<128x128xf32>
    %9 = tpu.matmul %7, %8, %cst_8 {dimension_numbers = #tpu.dot_dimension_numbers<[1], [0], [0], [1], [0, 0, 1, 1], [], []>} : vector<128x128xf32>, vector<128x128xf32>, vector<128x128xf32> -> vector<128x128xf32>
    %c0_9 = arith.constant 0 : index
    %c0_10 = arith.constant 0 : index
    %10 = vector.load %arg5[%c0_9, %c0_10] : memref<1x128xf32, #tpu.memory_space<vmem>>, vector<1x128xf32>
    %11 = vector.broadcast %10 : vector<1x128xf32> to vector<128x128xf32>
    %12 = arith.addf %9, %11 : vector<128x128xf32>
    %cst_11 = arith.constant 0.000000e+00 : f32
    %13 = vector.broadcast %cst_11 : f32 to vector<128x128xf32>
    %14 = arith.maximumf %12, %13 : vector<128x128xf32>
    %c0_12 = arith.constant 0 : index
    %c0_13 = arith.constant 0 : index
    %15 = vector.load %arg6[%c0_12, %c0_13] : memref<128x128xf32, #tpu.memory_space<vmem>>, vector<128x128xf32>
    %cst_14 = arith.constant dense<0.000000e+00> : vector<128x128xf32>
    %16 = tpu.matmul %14, %15, %cst_14 {dimension_numbers = #tpu.dot_dimension_numbers<[1], [0], [0], [1], [0, 0, 1, 1], [], []>} : vector<128x128xf32>, vector<128x128xf32>, vector<128x128xf32> -> vector<128x128xf32>
    %c0_15 = arith.constant 0 : index
    %c0_16 = arith.constant 0 : index
    %17 = vector.load %arg7[%c0_15, %c0_16] : memref<1x128xf32, #tpu.memory_space<vmem>>, vector<1x128xf32>
    %18 = vector.broadcast %17 : vector<1x128xf32> to vector<128x128xf32>
    %19 = arith.addf %16, %18 : vector<128x128xf32>
    %cst_17 = arith.constant 0.000000e+00 : f32
    %20 = vector.broadcast %cst_17 : f32 to vector<128x128xf32>
    %21 = arith.maximumf %19, %20 : vector<128x128xf32>
    %c0_18 = arith.constant 0 : index
    %c0_19 = arith.constant 0 : index
    %22 = vector.load %arg8[%c0_18, %c0_19] : memref<128x128xf32, #tpu.memory_space<vmem>>, vector<128x128xf32>
    %cst_20 = arith.constant dense<0.000000e+00> : vector<128x128xf32>
    %23 = tpu.matmul %21, %22, %cst_20 {dimension_numbers = #tpu.dot_dimension_numbers<[1], [0], [0], [1], [0, 0, 1, 1], [], []>} : vector<128x128xf32>, vector<128x128xf32>, vector<128x128xf32> -> vector<128x128xf32>
    %c0_21 = arith.constant 0 : index
    %c0_22 = arith.constant 0 : index
    %24 = vector.load %arg9[%c0_21, %c0_22] : memref<1x128xf32, #tpu.memory_space<vmem>>, vector<1x128xf32>
    %25 = vector.broadcast %24 : vector<1x128xf32> to vector<128x128xf32>
    %26 = arith.addf %23, %25 : vector<128x128xf32>
    %c0_23 = arith.constant 0 : index
    %c0_24 = arith.constant 0 : index
    %27 = vector.load %arg10[%c0_23, %c0_24] : memref<128x128xf32, #tpu.memory_space<vmem>>, vector<128x128xf32>
    tpu.vector_store %arg10[%c0_23, %c0_24], %26 {strides = array<i32>} : memref<128x128xf32, #tpu.memory_space<vmem>>, vector<128x128xf32>,
    return
  }
  func.func @transform_0(%arg0: i32) -> (i32, i32) {
    %c0_i32 = arith.constant 0 : i32
    %c0_i32_0 = arith.constant 0 : i32
    return %arg0, %c0_i32 : i32, i32
  }
  func.func @transform_1(%arg0: i32) -> (i32, i32) {
    %c0_i32 = arith.constant 0 : i32
    %c0_i32_0 = arith.constant 0 : i32
    %c0_i32_1 = arith.constant 0 : i32
    return %c0_i32, %c0_i32_0 : i32, i32
  }
  func.func @transform_2(%arg0: i32) -> (i32, i32) {
    %c0_i32 = arith.constant 0 : i32
    %c0_i32_0 = arith.constant 0 : i32
    %c0_i32_1 = arith.constant 0 : i32
    return %c0_i32, %c0_i32_0 : i32, i32
  }
  func.func @transform_3(%arg0: i32) -> (i32, i32) {
    %c0_i32 = arith.constant 0 : i32
    %c0_i32_0 = arith.constant 0 : i32
    %c0_i32_1 = arith.constant 0 : i32
    return %c0_i32, %c0_i32_0 : i32, i32
  }
  func.func @transform_4(%arg0: i32) -> (i32, i32) {
    %c0_i32 = arith.constant 0 : i32
    %c0_i32_0 = arith.constant 0 : i32
    %c0_i32_1 = arith.constant 0 : i32
    return %c0_i32, %c0_i32_0 : i32, i32
  }
  func.func @transform_5(%arg0: i32) -> (i32, i32) {
    %c0_i32 = arith.constant 0 : i32
    %c0_i32_0 = arith.constant 0 : i32
    %c0_i32_1 = arith.constant 0 : i32
    return %c0_i32, %c0_i32_0 : i32, i32
  }
  func.func @transform_6(%arg0: i32) -> (i32, i32) {
    %c0_i32 = arith.constant 0 : i32
    %c0_i32_0 = arith.constant 0 : i32
    %c0_i32_1 = arith.constant 0 : i32
    return %c0_i32, %c0_i32_0 : i32, i32
  }
  func.func @transform_7(%arg0: i32) -> (i32, i32) {
    %c0_i32 = arith.constant 0 : i32
    %c0_i32_0 = arith.constant 0 : i32
    %c0_i32_1 = arith.constant 0 : i32
    return %c0_i32, %c0_i32_0 : i32, i32
  }
  func.func @transform_8(%arg0: i32) -> (i32, i32) {
    %c0_i32 = arith.constant 0 : i32
    %c0_i32_0 = arith.constant 0 : i32
    %c0_i32_1 = arith.constant 0 : i32
    return %c0_i32, %c0_i32_0 : i32, i32
  }
  func.func @transform_9(%arg0: i32) -> (i32, i32) {
    %c0_i32 = arith.constant 0 : i32
    %c0_i32_0 = arith.constant 0 : i32
    return %arg0, %c0_i32 : i32, i32
  }
}

</mosaic_0001>

<bundles_post_ra>
// kernel: tpu_custom_call.1
= control target key start
LH: loop header
LB: loop body
LE: loop exit
PB: predicated region body
PF: predicated region fallthrough
CT: control target
= control target key end

     0   :  { %s1638_s0 = inlined_call_operand.hbm [shape: f32[256,128], index: 0, kind: input, shape index: {}]   ;;  %s1639_s1 = inlined_call_operand.hbm [shape: f32[128,128], index: 1, kind: input, shape index: {}]   ;;  %s1640_s2 = inlined_call_operand.vmem [shape: f32[1,128], index: 2, kind: input, shape index: {}]   ;;  %s1641_s3 = inlined_call_operand.hbm [shape: f32[128,128], index: 3, kind: input, shape index: {}]   ;;  %s1642_s4 = inlined_call_operand.vmem [shape: f32[1,128], index: 4, kind: input, shape index: {}]   ;;  %s1643_s5 = inlined_call_operand.hbm [shape: f32[128,128], index: 5, kind: input, shape index: {}]   ;;  %s1644_s6 = inlined_call_operand.vmem [shape: f32[1,128], index: 6, kind: input, shape index: {}]   ;;  %s1645_s7 = inlined_call_operand.hbm [shape: f32[128,128], index: 7, kind: input, shape index: {}]   ;;  %s1646_s8 = inlined_call_operand.vmem [shape: f32[1,128], index: 8, kind: input, shape index: {}]   ;;  %s1647_s9 = inlined_call_operand.hbm [shape: f32[256,128], index: 9, kind: output, shape index: {}]  }
   0x1   :  { %1650 = sst [smem:[#allocation16_spill]] %s1639_s1 }
   0x2   :  { %1651 = sst [smem:[#allocation17_spill]] %s1641_s3 }
   0x3   :  { %1652 = sst [smem:[#allocation18_spill]] %s1643_s5 }
   0x4   :  { %14 = vsyncpa [#allocation3], 0 }
   0x5   :  { %16 = vsyncpa [#allocation3 + $0x1], 0 }
   0x6   :  { %17 = vsyncpa [#allocation6], 0 }
   0x7   :  { %18 = vsyncpa [#allocation9], 0 }
   0x8   :  { %19 = vsyncpa [#allocation4], 0 }
   0x9   :  { %21 = vsyncpa [#allocation4 + $0x1], 0  ;;  %s1371_s30 = smov 0   ;;  %s1373_s10 = smov 0  }
   0xa   :  { %s1375_s11 = smov 0   ;;  %s1377_s12 = smov 0  }
   0xb LB: > { %s1392_s13 = sadd.s32 4294967295, %s1311_s12   ;;  %s968_s14 = sadd.s32 4294967294, %s1311_s12   ;;  %s1311_s12 = sphi %s1377_s12, %s1668_s12   ;;  %s1307_s11 = sphi %s1375_s11, %s1667_s11   ;;  %s1303_s10 = sphi %s1373_s10, %s1666_s10   ;;  %s1299_s30 = sphi %s1371_s30, %s1665_s30  }
   0xc   : > { %p47_p0 = scmp.ne.s32.totalorder %s1303_s10, %s1299_s30  ;;  %p48_p1 = scmp.eq.s32.totalorder %s1392_s13, 0 }
   0xd   : > { %p239_p2 = scmp.eq.s32.totalorder %s1392_s13, 1  ;;  %p245_p3 = scmp.eq.s32.totalorder %s968_s14, 1 }
   0xe   : > { %p1401_p4 = por %p48_p1, %p47_p0  ;;  %p969_p5 = scmp.ge.s32.totalorder %s1311_s12, 1 }
   0xf   : > { %p1406_p6 = por %p245_p3, %p47_p0  ;;  %p252_p7 = scmp.lt.s32.totalorder %s1311_s12, 3 }
  0x10   : > { %s1655_s1 = sld [smem:[#allocation16_spill]]  ;;  %s1313_s21 = smov [#allocation5]  }
  0x11   : > { %p1414_p8 = pnand %p969_p5, %p252_p7  ;;  %s265_s22 = sshll.u32 %s1313_s21, 4  ;;  %s266_s22 = int_to_ptr.vmem [resolvable:$true] %s265_s22 }
  0x12   : > { %s1658_s5 = sld [smem:[#allocation18_spill]]  ;;  %s1648_s27 = smov 128  }
  0x13   : > { %p1012_p9 = pneg %p1414_p8  ;;  %s1649_s28 = smov 8  }
  0x14   : > { %s1316_s29 = smov [#allocation8]   ;;  %s1659_s3 = sld [smem:[#allocation17_spill]] }
  0x15   : > { %p1422_p10 = pnand %p1012_p9, %p48_p1  ;;  %s299_s14 = sshll.u32 %s1316_s29, 4  ;;  %s300_s14 = int_to_ptr.vmem [resolvable:$true] %s299_s14 }
  0x16   : > { %s263_s19 = sshll.u32 %s1655_s1, 4  ;;  %s314_s24 = sshll.u32 %s1645_s7, 4  ;;  %s264_s19 = int_to_ptr.hbm [resolvable:$true] %s263_s19  ;;  %s315_s24 = int_to_ptr.hbm [resolvable:$true] %s314_s24 }
  0x17   : > { %1015 = dma.hbm_to_vmem [thread:$0]  (!%p1422_p10), %s264_s19, 2048, %s266_s22, [#allocation6], %s1648_s27, %s1648_s27, %s1649_s28  }
  0x18   : > { %s297_s26 = sshll.u32 %s1658_s5, 4  ;;  %s1317_s25 = smov [#allocation7]   ;;  %s298_s26 = int_to_ptr.hbm [resolvable:$true] %s297_s26 }
  0x19   : > { %1021 = dma.hbm_to_vmem [thread:$0]  (!%p1422_p10), %s298_s26, 2048, %s300_s14, [#allocation9], %s1648_s27, %s1648_s27, %s1649_s28  }
  0x1a   : > { %s280_s21 = sshll.u32 %s1659_s3, 4  ;;  %s282_s29 = sshll.u32 %s1317_s25, 4  ;;  %s281_s21 = int_to_ptr.hbm [resolvable:$true] %s280_s21  ;;  %s283_s29 = int_to_ptr.vmem [resolvable:$true] %s282_s29 }
  0x1b   : > { %1018 = dma.hbm_to_vmem [thread:$0]  (!%p1422_p10), %s281_s21, 2048, %s283_s29, [#allocation6], %s1648_s27, %s1648_s27, %s1649_s28  }
  0x1c   : > { %s1318_s17 = smov [#allocation10]   ;;  %s1457_s14 = sadd.s32 1, %s1311_s12  }
  0x1d   : > { %s316_s26 = sshll.u32 %s1318_s17, 4  ;;  %s34_s18 = sadd.s32 1, %s1307_s11  ;;  %s317_s26 = int_to_ptr.vmem [resolvable:$true] %s316_s26 }
  0x1e   : > { %1024 = dma.hbm_to_vmem [thread:$0]  (!%p1422_p10), %s315_s24, 2048, %s317_s26, [#allocation9], %s1648_s27, %s1648_s27, %s1649_s28  }
  0x1f   : > { %s31_s19 = ssub.s32 %s1311_s12, %s1457_s14  ;;  %p41_p12 = scmp.ne.s32.totalorder %s1307_s11, %s1303_s10 }
  0x20   : > { %p32_p13 = scmp.eq.s32.totalorder %s31_s19, 0  ;;  %p42_p0 = scmp.eq.s32.totalorder %s1311_s12, 0 }
  0x21   : > { %p1467_p3 = por %p239_p2, %p41_p12  ;;  %p1037_p5 = scmp.lt.s32.totalorder %s1311_s12, 2 }
  0x22   : > { %s1473_s22 = scalar_select %p32_p13, %s1307_s11, %s34_s18  }
  0x23   : > { %p43_p7 = por %p42_p0, %p41_p12  ;;  %s333_s23 = sand.u32 1, %s1307_s11  }
  0x24   : > { %s975_s25 = sshll.u32 %s333_s23, 7  ;;  %s990_s24 = sshll.u32 %s1311_s12, 7 }
  0x25   : > { %s342_s26 = scalar_lea.hbm %s1638_s0, %s990_s24  ;;  %s337_s27 = scalar_lea.vmem [#allocation2], %s975_s25 }
  0x26   : > { %s345_s28 = sshll.u32 %s337_s27, 4  ;;  %s343_s19 = sshll.u32 %s342_s26, 4  ;;  %s346_s28 = int_to_ptr.vmem [resolvable:$true] %s345_s28  ;;  %s344_s19 = int_to_ptr.hbm [resolvable:$true] %s343_s19 }
  0x27   : > { %p1480_p2 = pnand %p1037_p5, %p43_p7  ;;  %s334_s18 = scalar_lea.sflag [#allocation3], %s333_s23 }
  0x28   : > { %s1207_s3 = sshra.s32 %s344_s19, 4  ;;  %s1214_s27 = scalar_lea.hbm %s1638_s0, 256  ;;  %s1208_s3 = int_to_ptr.hbm [resolvable:$true] %s1207_s3 }
  0x29   : > { %s1209_s5 = scalar_lea.hbm %s1208_s3, 128  ;;  %p1211_p10 = pneg %p1480_p2 }
  0x2a   : > { %p1210_p9 = scmp.ne.s32.totalorder %s1208_s3, %s1209_s5  ;;  %p1215_p0 = scmp.lt.s32.totalorder %s1208_s3, %s1638_s0 }
  0x2b   : > { %p1216_p5 = scmp.lt.s32.totalorder %s1214_s27, %s1209_s5 }
  0x2c   : > { %p1212_p12 = pnand %p1211_p10, %p1210_p9 }
  0x2d   : > { %p1217_p7 = por %p1216_p5, %p1215_p0 }
  0x2e   : > { %p1213_p13 = pneg %p1212_p12 }
  0x30   : > { %p1218_p11 = pnand %p1217_p7, %p1213_p13 }
  0x32   : > { %1221 = shalt.err (!%p1218_p11)
}
  0x33   : > { %s1662_s23 = smov 8   ;;  %s1663_s26 = smov 128  }
  0x34   : > { %1028 = dma.hbm_to_vmem [thread:$0]  (!%p1480_p2), %s344_s19, 2048, %s346_s28, %s334_s18, %s1663_s26, %s1663_s26, %s1662_s23  }
  0x35   : > { %357 = sbr.rel (%p1414_p8) target bundleno = 749 (0x2ed), region = 56  ;;  %s1500_s24 = sand.u32 (!%p1414_p8), 1, %s1303_s10  }
  0x36   : > { %s979_s3 = sshll.u32 (!%p1414_p8), %s1500_s24, 7  ;;  %s360_s5 = scalar_lea.sflag (!%p1414_p8), [#allocation3], %s1500_s24 }
  0x37   : > { %s1506_s25 = scalar_lea.vmem (!%p1414_p8), [#allocation2], %s979_s3 }
  0x3a   : > { %1282 = dma.done.wait (%p1401_p4), %s360_s5, 2048  }
  0x3b   : > { %1284 = vsyncadd (%p1401_p4), %s360_s5, 4294965248 }
  0x3c   : > { %1286 = dma.done.wait (%p48_p1), [#allocation6], 4096  }
  0x3d   : > { %1288 = vsyncadd (%p48_p1), [#allocation6], 4294963200 }
  0x3e   : > { %1290 = dma.done.wait (%p48_p1), [#allocation9], 4096  }
  0x3f   : > { %1292 = vsyncadd (%p48_p1), [#allocation9], 4294963200  ;;  %v452_v0 = vld [vmem:[#allocation5 + $0x78] sm:$0xff]  ;;  %v451_v1 = vld [vmem:[#allocation5 + $0x70] sm:$0xff]  ;;  %s1586_s17 = scalar_lea.vmem [#allocation11], %s979_s3  ;;  %s991_s23 = sshll.u32 %s1392_s13, 7 }
  0x40   : > { %457 = vmatpush.msra.mxu0 %v452_v0  ;;  %v450_v2 = vld [vmem:[#allocation5 + $0x68] sm:$0xff]  ;;  %v449_v3 = vld [vmem:[#allocation5 + $0x60] sm:$0xff]  ;;  %v448_v4 = vld [vmem:[#allocation5 + $0x58] sm:$0xff]  ;;  %s853_s5 = scalar_lea.hbm %s1647_s9, %s991_s23  ;;  %s842_s15 = scalar_lea.sflag [#allocation4], %s1500_s24 }
  0x41   : > { %v447_v5 = vld [vmem:[#allocation5 + $0x50] sm:$0xff]  ;;  %v446_v6 = vld [vmem:[#allocation5 + $0x48] sm:$0xff]  ;;  %v445_v7 = vld [vmem:[#allocation5 + $0x40] sm:$0xff]  ;;  %s856_s1 = sshll.u32 %s853_s5, 4  ;;  %s1257_s18 = scalar_lea.hbm %s1647_s9, 256  ;;  %s857_s1 = int_to_ptr.hbm [resolvable:$true] %s856_s1 }
  0x42   : > { %458 = vmatpush.msra.mxu0 %v451_v1  ;;  %v444_v8 = vld [vmem:[#allocation5 + $0x38] sm:$0xff]  ;;  %v443_v9 = vld [vmem:[#allocation5 + $0x30] sm:$0xff]  ;;  %v442_v10 = vld [vmem:[#allocation5 + $0x28] sm:$0xff]  ;;  %s1251_s20 = sshra.s32 %s857_s1, 4  ;;  %s1252_s20 = int_to_ptr.hbm [resolvable:$true] %s1251_s20 }
  0x43   : > { %v441_v11 = vld [vmem:[#allocation5 + $0x20] sm:$0xff]  ;;  %v440_v12 = vld [vmem:[#allocation5 + $0x18] sm:$0xff]  ;;  %v439_v13 = vld [vmem:[#allocation5 + $0x10] sm:$0xff]  ;;  %s1253_s28 = scalar_lea.hbm %s1252_s20, 128  ;;  %p1258_p11 = scmp.lt.s32.totalorder %s1252_s20, %s1647_s9 }
  0x44   : > { %459 = vmatpush.msra.mxu0 %v450_v2  ;;  %v438_v14 = vld [vmem:[#allocation5 + $0x8] sm:$0xff]  ;;  %v437_v15 = vld [vmem:[#allocation5] sm:$0xff]  ;;  %v423_v18 = vld [vmem:[%s1506_s25 + $0x10] sm:$0xff]  ;;  %p1254_p1 = scmp.ne.s32.totalorder %s1252_s20, %s1253_s28  ;;  %p1259_p2 = scmp.lt.s32.totalorder %s1257_s18, %s1253_s28 }
  0x45   : > { %v421_v16 = vld [vmem:[%s1506_s25] sm:$0xff]  ;;  %v422_v17 = vld [vmem:[%s1506_s25 + $0x8] sm:$0xff]  ;;  %v424_v19 = vld [vmem:[%s1506_s25 + $0x18] sm:$0xff] }
  0x46   : > { %460 = vmatpush.msra.mxu0 %v449_v3  ;;  %v425_v20 = vld [vmem:[%s1506_s25 + $0x20] sm:$0xff]  ;;  %v426_v21 = vld [vmem:[%s1506_s25 + $0x28] sm:$0xff]  ;;  %v427_v22 = vld [vmem:[%s1506_s25 + $0x30] sm:$0xff]  ;;  %p1255_p4 = pnand %p1254_p1, %p1467_p3  ;;  %p1260_p9 = por %p1259_p2, %p1258_p11 }
  0x47   : > { %v428_v23 = vld [vmem:[%s1506_s25 + $0x38] sm:$0xff]  ;;  %v429_v24 = vld [vmem:[%s1506_s25 + $0x40] sm:$0xff]  ;;  %v552_v26 = vld [vmem:[#allocation7 + $0x70] sm:$0xff] }
  0x48   : > { %461 = vmatpush.msra.mxu0 %v448_v4  ;;  %v553_v25 = vld [vmem:[#allocation7 + $0x78] sm:$0xff]  ;;  %v551_v27 = vld [vmem:[#allocation7 + $0x68] sm:$0xff]  ;;  %v550_v29 = vld [vmem:[#allocation7 + $0x60] sm:$0xff]  ;;  %p1256_p8 = pneg %p1255_p4 }
  0x49   : > { %558 = vmatpush.msra.mxu1 %v553_v25  ;;  %v430_v28 = vld [vmem:[%s1506_s25 + $0x48] sm:$0xff]  ;;  %v549_v30 = vld [vmem:[#allocation7 + $0x58] sm:$0xff]  ;;  %v548_v31 = vld [vmem:[#allocation7 + $0x50] sm:$0xff] }
  0x4a   : > { %462 = vmatpush.msra.mxu0 %v447_v5  ;;  %v547_v32 = vld [vmem:[#allocation7 + $0x48] sm:$0xff]  ;;  %v431_v33 = vld [vmem:[%s1506_s25 + $0x50] sm:$0xff]  ;;  %v546_v34 = vld [vmem:[#allocation7 + $0x40] sm:$0xff]  ;;  %p1261_p10 = pnand %p1260_p9, %p1256_p8 }
  0x4b   : > { %559 = vmatpush.msra.mxu1 %v552_v26  ;;  %v545_v35 = vld [vmem:[#allocation7 + $0x38] sm:$0xff]  ;;  %v544_v36 = vld [vmem:[#allocation7 + $0x30] sm:$0xff]  ;;  %v543_v37 = vld [vmem:[#allocation7 + $0x28] sm:$0xff] }
  0x4c   : > { %463 = vmatpush.msra.mxu0 %v446_v6  ;;  %v432_v38 = vld [vmem:[%s1506_s25 + $0x58] sm:$0xff]  ;;  %v542_v39 = vld [vmem:[#allocation7 + $0x20] sm:$0xff]  ;;  %v540_v41 = vld [vmem:[#allocation7 + $0x10] sm:$0xff] }
  0x4d   : > { %560 = vmatpush.msra.mxu1 %v551_v27  ;;  %v541_v40 = vld [vmem:[#allocation7 + $0x18] sm:$0xff]  ;;  %v433_v42 = vld [vmem:[%s1506_s25 + $0x60] sm:$0xff]  ;;  %v539_v43 = vld [vmem:[#allocation7 + $0x8] sm:$0xff] }
  0x4e   : > { %464 = vmatpush.msra.mxu0 %v445_v7  ;;  %v538_v44 = vld [vmem:[#allocation7] sm:$0xff]  ;;  %v434_v45 = vld [vmem:[%s1506_s25 + $0x68] sm:$0xff]  ;;  %v435_v46 = vld [vmem:[%s1506_s25 + $0x70] sm:$0xff] }
  0x4f   : > { %561 = vmatpush.msra.mxu1 %v550_v29  ;;  %v436_v47 = vld [vmem:[%s1506_s25 + $0x78] sm:$0xff]  ;;  %v1539_v48 = vld [vmem:[%s1640_s2] ss:$0 sm:$0xff]  ;;  %v645_v29 = vld [vmem:[#allocation8 + $0x30] sm:$0xff]  ;;  %s854_s25 = sshll.u32 %s1586_s17, 4  ;;  %s855_s25 = int_to_ptr.vmem [resolvable:$true] %s854_s25 }
  0x50   : > { %465 = vmatpush.msra.mxu0 %v444_v8  ;;  %v647_v25 = vld [vmem:[#allocation8 + $0x40] sm:$0xff]  ;;  %v646_v26 = vld [vmem:[#allocation8 + $0x38] sm:$0xff] }
  0x51   : > { %562 = vmatpush.msra.mxu1 %v549_v30 }
  0x52   : > { %466 = vmatpush.msra.mxu0 %v443_v9 }
  0x53   : > { %563 = vmatpush.msra.mxu1 %v548_v31  ;;  %v644_v31 = vld [vmem:[#allocation8 + $0x28] sm:$0xff] }
  0x54   : > { %467 = vmatpush.msra.mxu0 %v442_v10 }
  0x55   : > { %564 = vmatpush.msra.mxu1 %v547_v32  ;;  %v643_v32 = vld [vmem:[#allocation8 + $0x20] sm:$0xff] }
  0x56   : > { %468 = vmatpush.msra.mxu0 %v441_v11 }
  0x57   : > { %565 = vmatpush.msra.mxu1 %v546_v34 }
  0x58   : > { %469 = vmatpush.msra.mxu0 %v440_v12  ;;  %v654_v12 = vld [vmem:[#allocation8 + $0x78] sm:$0xff] }
  0x59   : > { %566 = vmatpush.msra.mxu1 %v545_v35  ;;  %659 = vmatpush.msra.mxu2 %v654_v12 }
  0x5a   : > { %470 = vmatpush.msra.mxu0 %v439_v13 }
  0x5b   : > { %567 = vmatpush.msra.mxu1 %v544_v36  ;;  %v641_v36 = vld [vmem:[#allocation8 + $0x10] sm:$0xff] }
  0x5c   : > { %471 = vmatpush.msra.mxu0 %v438_v14 }
  0x5d   : > { %568 = vmatpush.msra.mxu1 %v543_v37 }
  0x5e   : > { %472 = vmatpush.msra.mxu0 %v437_v15  ;;  %v653_v15 = vld [vmem:[#allocation8 + $0x70] sm:$0xff] }
  0x5f   : > { %473 = vmatmul.f32.vlgmr.msra.gmra.mxu0 %v421_v16  ;;  %569 = vmatpush.msra.mxu1 %v542_v39  ;;  %v639_v39 = vld [vmem:[#allocation8] sm:$0xff] }
  0x60   : > { %660 = vmatpush.msra.mxu2 %v653_v15 }
  0x61   : > { %570 = vmatpush.msra.mxu1 %v541_v40 }
  0x63   : > { %571 = vmatpush.msra.mxu1 %v540_v41 }
  0x65   : > { %572 = vmatpush.msra.mxu1 %v539_v43 }
  0x67   : > { %476 = vmatmul.f32.gmra.mxu0 %v422_v17  ;;  %573 = vmatpush.msra.mxu1 %v538_v44  ;;  %v652_v17 = vld [vmem:[#allocation8 + $0x68] sm:$0xff] }
  0x68   : > { %661 = vmatpush.msra.mxu2 %v652_v17  ;;  %v754_v17 = vld [vmem:[#allocation10 + $0x70] sm:$0xff] }
  0x6f   : > { %479 = vmatmul.f32.gmra.mxu0 %v423_v18  ;;  %v651_v18 = vld [vmem:[#allocation8 + $0x60] sm:$0xff] }
  0x70   : > { %662 = vmatpush.msra.mxu2 %v651_v18 }
  0x77   : > { %482 = vmatmul.f32.gmra.mxu0 %v424_v19  ;;  %v650_v19 = vld [vmem:[#allocation8 + $0x58] sm:$0xff] }
  0x78   : > { %663 = vmatpush.msra.mxu2 %v650_v19 }
  0x7f   : > { %485 = vmatmul.f32.gmra.mxu0 %v425_v20 }
  0x87   : > { %488 = vmatmul.f32.gmra.mxu0 %v426_v21 }
  0x8f   : > { %491 = vmatmul.f32.gmra.mxu0 %v427_v22  ;;  %v649_v22 = vld [vmem:[#allocation8 + $0x50] sm:$0xff] }
  0x90   : > { %664 = vmatpush.msra.mxu2 %v649_v22  ;;  %v752_v22 = vld [vmem:[#allocation10 + $0x60] sm:$0xff] }
  0x97   : > { %494 = vmatmul.f32.gmra.mxu0 %v428_v23 }
  0x9f   : > { %497 = vmatmul.f32.gmra.mxu0 %v429_v24  ;;  %v648_v24 = vld [vmem:[#allocation8 + $0x48] sm:$0xff] }
  0xa0   : > { %665 = vmatpush.msra.mxu2 %v648_v24  ;;  %v750_v24 = vld [vmem:[#allocation10 + $0x50] sm:$0xff] }
  0xa2   : > { %666 = vmatpush.msra.mxu2 %v647_v25 }
  0xa4   : > { %667 = vmatpush.msra.mxu2 %v646_v26 }
  0xa6   : > { %668 = vmatpush.msra.mxu2 %v645_v29  ;;  %v748_v29 = vld [vmem:[#allocation10 + $0x40] sm:$0xff] }
  0xa7   : > { %500 = vmatmul.f32.gmra.mxu0 %v430_v28 }
  0xa8   : > { %669 = vmatpush.msra.mxu2 %v644_v31  ;;  %v746_v31 = vld [vmem:[#allocation10 + $0x30] sm:$0xff] }
  0xaa   : > { %670 = vmatpush.msra.mxu2 %v643_v32  ;;  %v745_v32 = vld [vmem:[#allocation10 + $0x28] sm:$0xff] }
  0xaf   : > { %503 = vmatmul.f32.gmra.mxu0 %v431_v33  ;;  %v642_v33 = vld [vmem:[#allocation8 + $0x18] sm:$0xff] }
  0xb0   : > { %671 = vmatpush.msra.mxu2 %v642_v33 }
  0xb2   : > { %672 = vmatpush.msra.mxu2 %v641_v36 }
  0xb7   : > { %506 = vmatmul.f32.gmra.mxu0 %v432_v38  ;;  %v640_v38 = vld [vmem:[#allocation8 + $0x8] sm:$0xff] }
  0xb8   : > { %673 = vmatpush.msra.mxu2 %v640_v38  ;;  %v742_v38 = vld [vmem:[#allocation10 + $0x10] sm:$0xff] }
  0xba   : > { %674 = vmatpush.msra.mxu2 %v639_v39 }
  0xbf   : > { %509 = vmatmul.f32.gmra.mxu0 %v433_v42 }
  0xc7   : > { %512 = vmatmul.f32.gmra.mxu0 %v434_v45 }
  0xcf   : > { %515 = vmatmul.f32.gmra.mxu0 %v435_v46 }
  0xd7   : > { %518 = vmatmul.f32.gmra.mxu0 %v436_v47 }
  0xdc   : > { %v474_v49 = vpop.f32.mrf.mxu0 }
  0xdd   : > { %v475_v50 = vadd.f32 %v1539_v48, %v474_v49 }
  0xdf   : > { %v522_v51 = vmax.f32 %v475_v50, 0.0  ;;  %v1560_v50 = vld [vmem:[%s1642_s4] ss:$0 sm:$0xff] }
  0xe1   : > { %574 = vmatmul.f32.vlgmr.msra.gmra.mxu1 %v522_v51 }
  0xe4   : > { %v477_v52 = vpop.f32.mrf.mxu0 }
  0xe5   : > { %v478_v53 = vadd.f32 %v1539_v48, %v477_v52 }
  0xe7   : > { %v523_v54 = vmax.f32 %v478_v53, 0.0 }
  0xe9   : > { %577 = vmatmul.f32.gmra.mxu1 %v523_v54 }
  0xec   : > { %v480_v55 = vpop.f32.mrf.mxu0 }
  0xed   : > { %v481_v56 = vadd.f32 %v1539_v48, %v480_v55 }
  0xef   : > { %v524_v57 = vmax.f32 %v481_v56, 0.0 }
  0xf1   : > { %580 = vmatmul.f32.gmra.mxu1 %v524_v57 }
  0xf4   : > { %v483_v58 = vpop.f32.mrf.mxu0 }
  0xf5   : > { %v484_v59 = vadd.f32 %v1539_v48, %v483_v58 }
  0xf7   : > { %v525_v60 = vmax.f32 %v484_v59, 0.0 }
  0xf9   : > { %583 = vmatmul.f32.gmra.mxu1 %v525_v60 }
  0xfc   : > { %v486_v61 = vpop.f32.mrf.mxu0 }
  0xfd   : > { %v487_v62 = vadd.f32 %v1539_v48, %v486_v61 }
  0xff   : > { %v526_v63 = vmax.f32 %v487_v62, 0.0 }
 0x101   : > { %586 = vmatmul.f32.gmra.mxu1 %v526_v63 }
 0x104   : > { %v489_v0 = vpop.f32.mrf.mxu0 }
 0x105   : > { %v490_v1 = vadd.f32 %v1539_v48, %v489_v0 }
 0x107   : > { %v527_v2 = vmax.f32 %v490_v1, 0.0 }
 0x109   : > { %589 = vmatmul.f32.gmra.mxu1 %v527_v2 }
 0x10c   : > { %v492_v3 = vpop.f32.mrf.mxu0 }
 0x10d   : > { %v493_v4 = vadd.f32 %v1539_v48, %v492_v3 }
 0x10f   : > { %v528_v5 = vmax.f32 %v493_v4, 0.0 }
 0x111   : > { %592 = vmatmul.f32.gmra.mxu1 %v528_v5 }
 0x114   : > { %v495_v6 = vpop.f32.mrf.mxu0 }
 0x115   : > { %v496_v7 = vadd.f32 %v1539_v48, %v495_v6 }
 0x117   : > { %v529_v8 = vmax.f32 %v496_v7, 0.0 }
 0x119   : > { %595 = vmatmul.f32.gmra.mxu1 %v529_v8 }
 0x11c   : > { %v498_v9 = vpop.f32.mrf.mxu0 }
 0x11d   : > { %v499_v10 = vadd.f32 %v1539_v48, %v498_v9 }
 0x11f   : > { %v530_v11 = vmax.f32 %v499_v10, 0.0 }
 0x121   : > { %598 = vmatmul.f32.gmra.mxu1 %v530_v11 }
 0x124   : > { %v501_v13 = vpop.f32.mrf.mxu0 }
 0x125   : > { %v502_v14 = vadd.f32 %v1539_v48, %v501_v13 }
 0x127   : > { %v531_v16 = vmax.f32 %v502_v14, 0.0 }
 0x129   : > { %601 = vmatmul.f32.gmra.mxu1 %v531_v16  ;;  %v755_v16 = vld [vmem:[#allocation10 + $0x78] sm:$0xff] }
 0x12a   : > { %760 = vmatpush.msra.mxu3 %v755_v16 }
 0x12c   : > { %v504_v20 = vpop.f32.mrf.mxu0  ;;  %761 = vmatpush.msra.mxu3 %v754_v17 }
 0x12d   : > { %v505_v21 = vadd.f32 %v1539_v48, %v504_v20  ;;  %v753_v20 = vld [vmem:[#allocation10 + $0x68] sm:$0xff] }
 0x12e   : > { %762 = vmatpush.msra.mxu3 %v753_v20 }
 0x12f   : > { %v532_v23 = vmax.f32 %v505_v21, 0.0 }
 0x130   : > { %763 = vmatpush.msra.mxu3 %v752_v22 }
 0x131   : > { %604 = vmatmul.f32.gmra.mxu1 %v532_v23  ;;  %v751_v23 = vld [vmem:[#allocation10 + $0x58] sm:$0xff] }
 0x132   : > { %764 = vmatpush.msra.mxu3 %v751_v23 }
 0x134   : > { %v507_v27 = vpop.f32.mrf.mxu0  ;;  %765 = vmatpush.msra.mxu3 %v750_v24 }
 0x135   : > { %v508_v28 = vadd.f32 %v1539_v48, %v507_v27  ;;  %v749_v27 = vld [vmem:[#allocation10 + $0x48] sm:$0xff] }
 0x136   : > { %766 = vmatpush.msra.mxu3 %v749_v27 }
 0x137   : > { %v533_v30 = vmax.f32 %v508_v28, 0.0 }
 0x138   : > { %767 = vmatpush.msra.mxu3 %v748_v29 }
 0x139   : > { %607 = vmatmul.f32.gmra.mxu1 %v533_v30  ;;  %v747_v30 = vld [vmem:[#allocation10 + $0x38] sm:$0xff] }
 0x13a   : > { %768 = vmatpush.msra.mxu3 %v747_v30 }
 0x13c   : > { %v510_v34 = vpop.f32.mrf.mxu0  ;;  %769 = vmatpush.msra.mxu3 %v746_v31 }
 0x13d   : > { %v511_v35 = vadd.f32 %v1539_v48, %v510_v34 }
 0x13e   : > { %770 = vmatpush.msra.mxu3 %v745_v32 }
 0x13f   : > { %v534_v37 = vmax.f32 %v511_v35, 0.0  ;;  %v744_v35 = vld [vmem:[#allocation10 + $0x20] sm:$0xff] }
 0x140   : > { %771 = vmatpush.msra.mxu3 %v744_v35  ;;  %v1086_v35 = vld [vmem:[%s1646_s8] ss:$0 sm:$0xff] }
 0x141   : > { %610 = vmatmul.f32.gmra.mxu1 %v534_v37  ;;  %v743_v37 = vld [vmem:[#allocation10 + $0x18] sm:$0xff] }
 0x142   : > { %772 = vmatpush.msra.mxu3 %v743_v37 }
 0x144   : > { %v513_v40 = vpop.f32.mrf.mxu0  ;;  %773 = vmatpush.msra.mxu3 %v742_v38 }
 0x145   : > { %v514_v41 = vadd.f32 %v1539_v48, %v513_v40 }
 0x147   : > { %v535_v42 = vmax.f32 %v514_v41, 0.0  ;;  %v741_v41 = vld [vmem:[#allocation10 + $0x8] sm:$0xff] }
 0x148   : > { %774 = vmatpush.msra.mxu3 %v741_v41 }
 0x149   : > { %613 = vmatmul.f32.gmra.mxu1 %v535_v42 }
 0x14c   : > { %v516_v43 = vpop.f32.mrf.mxu0 }
 0x14d   : > { %v517_v44 = vadd.f32 %v1539_v48, %v516_v43  ;;  %v740_v43 = vld [vmem:[#allocation10] sm:$0xff] }
 0x14e   : > { %775 = vmatpush.msra.mxu3 %v740_v43 }
 0x14f   : > { %v536_v45 = vmax.f32 %v517_v44, 0.0 }
 0x151   : > { %616 = vmatmul.f32.gmra.mxu1 %v536_v45 }
 0x154   : > { %v519_v46 = vpop.f32.mrf.mxu0 }
 0x155   : > { %v520_v47 = vadd.f32 %v1539_v48, %v519_v46 }
 0x157   : > { %v537_v49 = vmax.f32 %v520_v47, 0.0 }
 0x159   : > { %619 = vmatmul.f32.gmra.mxu1 %v537_v49 }
 0x15e   : > { %v575_v51 = vpop.f32.mrf.mxu1 }
 0x15f   : > { %v576_v52 = vadd.f32 %v1560_v50, %v575_v51 }
 0x161   : > { %v623_v53 = vmax.f32 %v576_v52, 0.0  ;;  %v1085_v52 = vld [vmem:[%s1644_s6] ss:$0 sm:$0xff] }
 0x163   : > { %675 = vmatmul.f32.vlgmr.msra.gmra.mxu2 %v623_v53 }
 0x166   : > { %v578_v54 = vpop.f32.mrf.mxu1 }
 0x167   : > { %v579_v55 = vadd.f32 %v1560_v50, %v578_v54 }
 0x169   : > { %v624_v56 = vmax.f32 %v579_v55, 0.0 }
 0x16b   : > { %678 = vmatmul.f32.gmra.mxu2 %v624_v56 }
 0x16e   : > { %v581_v57 = vpop.f32.mrf.mxu1 }
 0x16f   : > { %v582_v48 = vadd.f32 %v1560_v50, %v581_v57 }
 0x171   : > { %v625_v58 = vmax.f32 %v582_v48, 0.0 }
 0x173   : > { %681 = vmatmul.f32.gmra.mxu2 %v625_v58 }
 0x176   : > { %v584_v59 = vpop.f32.mrf.mxu1 }
 0x177   : > { %v585_v60 = vadd.f32 %v1560_v50, %v584_v59 }
 0x179   : > { %v626_v61 = vmax.f32 %v585_v60, 0.0 }
 0x17b   : > { %684 = vmatmul.f32.gmra.mxu2 %v626_v61 }
 0x17e   : > { %v587_v62 = vpop.f32.mrf.mxu1 }
 0x17f   : > { %v588_v63 = vadd.f32 %v1560_v50, %v587_v62 }
 0x181   : > { %v627_v0 = vmax.f32 %v588_v63, 0.0 }
 0x183   : > { %687 = vmatmul.f32.gmra.mxu2 %v627_v0 }
 0x186   : > { %v590_v1 = vpop.f32.mrf.mxu1 }
 0x187   : > { %v591_v2 = vadd.f32 %v1560_v50, %v590_v1 }
 0x189   : > { %v628_v3 = vmax.f32 %v591_v2, 0.0 }
 0x18b   : > { %690 = vmatmul.f32.gmra.mxu2 %v628_v3 }
 0x18e   : > { %v593_v4 = vpop.f32.mrf.mxu1 }
 0x18f   : > { %v594_v5 = vadd.f32 %v1560_v50, %v593_v4 }
 0x191   : > { %v629_v6 = vmax.f32 %v594_v5, 0.0 }
 0x193   : > { %693 = vmatmul.f32.gmra.mxu2 %v629_v6 }
 0x196   : > { %v596_v7 = vpop.f32.mrf.mxu1 }
 0x197   : > { %v597_v8 = vadd.f32 %v1560_v50, %v596_v7 }
 0x199   : > { %v630_v9 = vmax.f32 %v597_v8, 0.0 }
 0x19b   : > { %696 = vmatmul.f32.gmra.mxu2 %v630_v9 }
 0x19e   : > { %v599_v10 = vpop.f32.mrf.mxu1 }
 0x19f   : > { %v600_v11 = vadd.f32 %v1560_v50, %v599_v10 }
 0x1a1   : > { %v631_v12 = vmax.f32 %v600_v11, 0.0 }
 0x1a3   : > { %699 = vmatmul.f32.gmra.mxu2 %v631_v12 }
 0x1a6   : > { %v602_v13 = vpop.f32.mrf.mxu1 }
 0x1a7   : > { %v603_v14 = vadd.f32 %v1560_v50, %v602_v13 }
 0x1a9   : > { %v632_v15 = vmax.f32 %v603_v14, 0.0 }
 0x1ab   : > { %702 = vmatmul.f32.gmra.mxu2 %v632_v15 }
 0x1ae   : > { %v605_v18 = vpop.f32.mrf.mxu1 }
 0x1af   : > { %v606_v19 = vadd.f32 %v1560_v50, %v605_v18 }
 0x1b1   : > { %v633_v21 = vmax.f32 %v606_v19, 0.0 }
 0x1b3   : > { %705 = vmatmul.f32.gmra.mxu2 %v633_v21 }
 0x1b6   : > { %v608_v25 = vpop.f32.mrf.mxu1 }
 0x1b7   : > { %v609_v26 = vadd.f32 %v1560_v50, %v608_v25 }
 0x1b9   : > { %v634_v28 = vmax.f32 %v609_v26, 0.0 }
 0x1bb   : > { %708 = vmatmul.f32.gmra.mxu2 %v634_v28 }
 0x1be   : > { %v611_v33 = vpop.f32.mrf.mxu1 }
 0x1bf   : > { %v612_v34 = vadd.f32 %v1560_v50, %v611_v33 }
 0x1c1   : > { %v635_v36 = vmax.f32 %v612_v34, 0.0 }
 0x1c3   : > { %711 = vmatmul.f32.gmra.mxu2 %v635_v36 }
 0x1c6   : > { %v614_v39 = vpop.f32.mrf.mxu1 }
 0x1c7   : > { %v615_v40 = vadd.f32 %v1560_v50, %v614_v39 }
 0x1c9   : > { %v636_v42 = vmax.f32 %v615_v40, 0.0 }
 0x1cb   : > { %714 = vmatmul.f32.gmra.mxu2 %v636_v42 }
 0x1ce   : > { %v617_v44 = vpop.f32.mrf.mxu1 }
 0x1cf   : > { %v618_v45 = vadd.f32 %v1560_v50, %v617_v44 }
 0x1d1   : > { %v637_v46 = vmax.f32 %v618_v45, 0.0 }
 0x1d3   : > { %717 = vmatmul.f32.gmra.mxu2 %v637_v46 }
 0x1d6   : > { %v620_v47 = vpop.f32.mrf.mxu1 }
 0x1d7   : > { %v621_v49 = vadd.f32 %v1560_v50, %v620_v47 }
 0x1d9   : > { %v638_v51 = vmax.f32 %v621_v49, 0.0 }
 0x1db   : > { %720 = vmatmul.f32.gmra.mxu2 %v638_v51 }
 0x1e6   : > { %v676_v53 = vpop.f32.mrf.mxu2 }
 0x1e7   : > { %v677_v54 = vadd.f32 %v1085_v52, %v676_v53 }
 0x1e9   : > { %v724_v55 = vmax.f32 %v677_v54, 0.0 }
 0x1eb   : > { %776 = vmatmul.f32.vlgmr.msra.gmra.mxu3 %v724_v55 }
 0x1ee   : > { %v679_v56 = vpop.f32.mrf.mxu2 }
 0x1ef   : > { %v680_v57 = vadd.f32 %v1085_v52, %v679_v56 }
 0x1f1   : > { %v725_v48 = vmax.f32 %v680_v57, 0.0 }
 0x1f3   : > { %779 = vmatmul.f32.gmra.mxu3 %v725_v48 }
 0x1f6   : > { %v682_v58 = vpop.f32.mrf.mxu2 }
 0x1f7   : > { %v683_v59 = vadd.f32 %v1085_v52, %v682_v58 }
 0x1f9   : > { %v726_v60 = vmax.f32 %v683_v59, 0.0 }
 0x1fb   : > { %782 = vmatmul.f32.gmra.mxu3 %v726_v60 }
 0x1fe   : > { %v685_v61 = vpop.f32.mrf.mxu2 }
 0x1ff   : > { %v686_v50 = vadd.f32 %v1085_v52, %v685_v61 }
 0x201   : > { %v727_v62 = vmax.f32 %v686_v50, 0.0 }
 0x203   : > { %785 = vmatmul.f32.gmra.mxu3 %v727_v62 }
 0x206   : > { %v688_v63 = vpop.f32.mrf.mxu2 }
 0x207   : > { %v689_v0 = vadd.f32 %v1085_v52, %v688_v63 }
 0x209   : > { %v728_v1 = vmax.f32 %v689_v0, 0.0 }
 0x20b   : > { %788 = vmatmul.f32.gmra.mxu3 %v728_v1 }
 0x20e   : > { %v691_v2 = vpop.f32.mrf.mxu2 }
 0x20f   : > { %v692_v3 = vadd.f32 %v1085_v52, %v691_v2 }
 0x211   : > { %v729_v4 = vmax.f32 %v692_v3, 0.0 }
 0x213   : > { %791 = vmatmul.f32.gmra.mxu3 %v729_v4 }
 0x216   : > { %v694_v5 = vpop.f32.mrf.mxu2 }
 0x217   : > { %v695_v6 = vadd.f32 %v1085_v52, %v694_v5 }
 0x219   : > { %v730_v7 = vmax.f32 %v695_v6, 0.0 }
 0x21b   : > { %794 = vmatmul.f32.gmra.mxu3 %v730_v7 }
 0x21e   : > { %v697_v8 = vpop.f32.mrf.mxu2 }
 0x21f   : > { %v698_v9 = vadd.f32 %v1085_v52, %v697_v8 }
 0x221   : > { %v731_v10 = vmax.f32 %v698_v9, 0.0 }
 0x223   : > { %797 = vmatmul.f32.gmra.mxu3 %v731_v10 }
 0x226   : > { %v700_v11 = vpop.f32.mrf.mxu2 }
 0x227   : > { %v701_v12 = vadd.f32 %v1085_v52, %v700_v11 }
 0x229   : > { %v732_v13 = vmax.f32 %v701_v12, 0.0 }
 0x22b   : > { %800 = vmatmul.f32.gmra.mxu3 %v732_v13 }
 0x22e   : > { %v703_v14 = vpop.f32.mrf.mxu2 }
 0x22f   : > { %v704_v15 = vadd.f32 %v1085_v52, %v703_v14 }
 0x231   : > { %v733_v16 = vmax.f32 %v704_v15, 0.0 }
 0x233   : > { %803 = vmatmul.f32.gmra.mxu3 %v733_v16 }
 0x236   : > { %v706_v17 = vpop.f32.mrf.mxu2 }
 0x237   : > { %v707_v18 = vadd.f32 %v1085_v52, %v706_v17 }
 0x239   : > { %v734_v19 = vmax.f32 %v707_v18, 0.0 }
 0x23b   : > { %806 = vmatmul.f32.gmra.mxu3 %v734_v19 }
 0x23e   : > { %v709_v20 = vpop.f32.mrf.mxu2 }
 0x23f   : > { %v710_v21 = vadd.f32 %v1085_v52, %v709_v20 }
 0x241   : > { %v735_v22 = vmax.f32 %v710_v21, 0.0 }
 0x243   : > { %809 = vmatmul.f32.gmra.mxu3 %v735_v22 }
 0x246   : > { %v712_v23 = vpop.f32.mrf.mxu2 }
 0x247   : > { %v713_v24 = vadd.f32 %v1085_v52, %v712_v23 }
 0x249   : > { %v736_v25 = vmax.f32 %v713_v24, 0.0 }
 0x24b   : > { %812 = vmatmul.f32.gmra.mxu3 %v736_v25 }
 0x24e   : > { %v715_v26 = vpop.f32.mrf.mxu2 }
 0x24f   : > { %v716_v27 = vadd.f32 %v1085_v52, %v715_v26 }
 0x251   : > { %v737_v28 = vmax.f32 %v716_v27, 0.0 }
 0x253   : > { %815 = vmatmul.f32.gmra.mxu3 %v737_v28 }
 0x256   : > { %v718_v29 = vpop.f32.mrf.mxu2 }
 0x257   : > { %v719_v30 = vadd.f32 %v1085_v52, %v718_v29 }
 0x259   : > { %v738_v31 = vmax.f32 %v719_v30, 0.0 }
 0x25b   : > { %818 = vmatmul.f32.gmra.mxu3 %v738_v31 }
 0x25e   : > { %v721_v32 = vpop.f32.mrf.mxu2 }
 0x25f   : > { %v722_v33 = vadd.f32 %v1085_v52, %v721_v32 }
 0x261   : > { %v739_v34 = vmax.f32 %v722_v33, 0.0 }
 0x263   : > { %821 = vmatmul.f32.gmra.mxu3 %v739_v34 }
 0x26e   : > { %v777_v36 = vpop.f32.mrf.mxu3 }
 0x26f   : > { %v778_v37 = vadd.f32 %v1086_v35, %v777_v36 }
 0x271   : > { %825 = vst [vmem:[%s1586_s17] sm:$0xff] %v778_v37 }
 0x276   : > { %v780_v38 = vpop.f32.mrf.mxu3 }
 0x277   : > { %v781_v39 = vadd.f32 %v1086_v35, %v780_v38 }
 0x279   : > { %826 = vst [vmem:[%s1586_s17 + $0x8] sm:$0xff] %v781_v39 }
 0x27e   : > { %v783_v40 = vpop.f32.mrf.mxu3 }
 0x27f   : > { %v784_v41 = vadd.f32 %v1086_v35, %v783_v40 }
 0x281   : > { %827 = vst [vmem:[%s1586_s17 + $0x10] sm:$0xff] %v784_v41 }
 0x286   : > { %v786_v42 = vpop.f32.mrf.mxu3 }
 0x287   : > { %v787_v43 = vadd.f32 %v1086_v35, %v786_v42 }
 0x289   : > { %828 = vst [vmem:[%s1586_s17 + $0x18] sm:$0xff] %v787_v43 }
 0x28e   : > { %v789_v44 = vpop.f32.mrf.mxu3 }
 0x28f   : > { %v790_v45 = vadd.f32 %v1086_v35, %v789_v44 }
 0x291   : > { %829 = vst [vmem:[%s1586_s17 + $0x20] sm:$0xff] %v790_v45 }
 0x296   : > { %v792_v46 = vpop.f32.mrf.mxu3 }
 0x297   : > { %v793_v47 = vadd.f32 %v1086_v35, %v792_v46 }
 0x299   : > { %830 = vst [vmem:[%s1586_s17 + $0x28] sm:$0xff] %v793_v47 }
 0x29e   : > { %v795_v49 = vpop.f32.mrf.mxu3 }
 0x29f   : > { %v796_v51 = vadd.f32 %v1086_v35, %v795_v49 }
 0x2a1   : > { %831 = vst [vmem:[%s1586_s17 + $0x30] sm:$0xff] %v796_v51 }
 0x2a6   : > { %v798_v52 = vpop.f32.mrf.mxu3 }
 0x2a7   : > { %v799_v53 = vadd.f32 %v1086_v35, %v798_v52 }
 0x2a9   : > { %832 = vst [vmem:[%s1586_s17 + $0x38] sm:$0xff] %v799_v53 }
 0x2ae   : > { %v801_v54 = vpop.f32.mrf.mxu3 }
 0x2af   : > { %v802_v55 = vadd.f32 %v1086_v35, %v801_v54 }
 0x2b1   : > { %833 = vst [vmem:[%s1586_s17 + $0x40] sm:$0xff] %v802_v55 }
 0x2b6   : > { %v804_v56 = vpop.f32.mrf.mxu3 }
 0x2b7   : > { %v805_v57 = vadd.f32 %v1086_v35, %v804_v56 }
 0x2b9   : > { %834 = vst [vmem:[%s1586_s17 + $0x48] sm:$0xff] %v805_v57 }
 0x2be   : > { %v807_v48 = vpop.f32.mrf.mxu3 }
 0x2bf   : > { %v808_v58 = vadd.f32 %v1086_v35, %v807_v48 }
 0x2c1   : > { %835 = vst [vmem:[%s1586_s17 + $0x50] sm:$0xff] %v808_v58 }
 0x2c6   : > { %v810_v59 = vpop.f32.mrf.mxu3 }
 0x2c7   : > { %v811_v60 = vadd.f32 %v1086_v35, %v810_v59 }
 0x2c9   : > { %836 = vst [vmem:[%s1586_s17 + $0x58] sm:$0xff] %v811_v60 }
 0x2ce   : > { %v813_v61 = vpop.f32.mrf.mxu3 }
 0x2cf   : > { %v814_v50 = vadd.f32 %v1086_v35, %v813_v61 }
 0x2d1   : > { %837 = vst [vmem:[%s1586_s17 + $0x60] sm:$0xff] %v814_v50 }
 0x2d6   : > { %v816_v62 = vpop.f32.mrf.mxu3 }
 0x2d7   : > { %v817_v63 = vadd.f32 %v1086_v35, %v816_v62 }
 0x2d9   : > { %838 = vst [vmem:[%s1586_s17 + $0x68] sm:$0xff] %v817_v63 }
 0x2de   : > { %v819_v0 = vpop.f32.mrf.mxu3 }
 0x2df   : > { %v820_v1 = vadd.f32 %v1086_v35, %v819_v0 }
 0x2e1   : > { %839 = vst [vmem:[%s1586_s17 + $0x70] sm:$0xff] %v820_v1 }
 0x2e6   : > { %v822_v2 = vpop.f32.mrf.mxu3 }
 0x2e7   : > { %v823_v3 = vadd.f32 %v1086_v35, %v822_v2 }
 0x2e9   : > { %840 = vst [vmem:[%s1586_s17 + $0x78] sm:$0xff] %v823_v3 }
 0x2ea   : > { %1264 = shalt.err (!%p1261_p10)
}
 0x2eb   : > { %s1319_s24 = smov 128   ;;  %s1320_s17 = smov 8  }
 0x2ec   : > { %1010 = dma.vmem_to_hbm [thread:$0]  (%p1467_p3), %s855_s25, 2048, %s857_s1, %s842_s15, %s1319_s24, %s1319_s24, %s1320_s17  }
 0x2ed PF: > { %s871_s23 = sand.u32 1, %s1299_s30   ;;  %p1664_p12 = scmp.ge.s32.totalorder %s1311_s12, 2 }
 0x2ee   : > { %s872_s26 = scalar_lea.sflag [#allocation4], %s871_s23 }
 0x2ef   : > { %p1030_p13 = pnand %p1664_p12, %p1406_p6 }
 0x2f1   : > { %p1031_p0 = pneg %p1030_p13 }
 0x2f3   : > { %1294 = dma.done.wait (%p1031_p0), %s872_s26, 2048  }
 0x2f4   : > { %1296 = vsyncadd (%p1031_p0), %s872_s26, 4294965248  ;;  %p24_p5 = scmp.ge.s32.totalorder %s1457_s14, 4   ;;  %s1665_s30 = smov %s1303_s10 }
 0x2f5   : > { %s1666_s10 = smov %s1307_s11  ;;  %s1667_s11 = smov %s1473_s22 }
 0x2f6   : > { %s1668_s12 = smov %s1457_s14  ;;  %26 = sbr.rel (!%p24_p5) target bundleno = 11 (0xb), region = 117 }
 0x2fb   :  { %878 = vsyncpa [#allocation3], 1 }
 0x2fc   :  { %880 = vsyncpa [#allocation3 + $0x1], 1 }
 0x2fd   :  { %881 = vsyncpa [#allocation6], 1 }
 0x2fe   :  { %882 = vsyncpa [#allocation9], 1 }
 0x2ff   :  { %883 = vsyncpa [#allocation4], 1 }
 0x300   :  { %885 = vsyncpa [#allocation4 + $0x1], 1 }

</bundles_post_ra>
